<compile_context>
chip_gen: v6e
topology: v6e:2x2x1
jax: 0.10.0
libtpu: 0.0.40
codegen_flags: <defaults>
</compile_context>

<pallas_src>
import jax
import jax.numpy as jnp
from jax.experimental import pallas as pl
from jax.experimental.pallas import tpu as pltpu


# --------------------------------------------------------------------------- #
# Kernels
# --------------------------------------------------------------------------- #
def _bilinear_kernel_single(x1_ref, wsum_ref, x2_ref, out_ref):
    """Whole reduction dim (F) resident in one block: grid = (B//tm, S//tn)."""
    acc = jnp.dot(x1_ref[...], wsum_ref[...], preferred_element_type=jnp.float32)
    out_ref[...] = (acc * x2_ref[...].astype(jnp.float32)).astype(out_ref.dtype)


def _bilinear_kernel_multi(x1_ref, wsum_ref, x2_ref, out_ref):
    """grid = (B//tm, S//tn, F//tk); F (k) is the trailing reduction axis.

    out_ref is f32 and its block index ignores k, so the output tile stays
    resident in VMEM across the K axis and is used directly as the accumulator
    (no scratch buffer, no finalize copy).
    """
    k = pl.program_id(2)

    @pl.when(k == 0)
    def _init():
        out_ref[...] = jnp.zeros_like(out_ref)

    # (tm, tk) @ (tk, tn) on the MXU, accumulated in f32 across the K grid axis.
    out_ref[...] += jnp.dot(
        x1_ref[...], wsum_ref[...], preferred_element_type=jnp.float32
    )

    @pl.when(k == pl.num_programs(2) - 1)
    def _finalize():
        # Elementwise scale by input2 (VPU) on the fully-reduced tile.
        out_ref[...] = out_ref[...] * x2_ref[...].astype(jnp.float32)


# --------------------------------------------------------------------------- #
# Tiling helpers
# --------------------------------------------------------------------------- #
_TM_CANDS = (512, 256, 128, 64, 32, 16, 8)
_TNK_CANDS = (2048, 1024, 512, 256, 128)


def _pick_tile(dim, candidates):
    """Largest candidate that evenly divides `dim`, else the full dimension
    (a full-dim block is always legal under the (8,128) rule)."""
    for c in candidates:
        if dim >= c and dim % c == 0:
            return c
    return dim


def _next_smaller(dim, cur, candidates, floor):
    for c in candidates:
        if c < cur and c >= floor and dim % c == 0:
            return c
    return cur


def _vmem_budget_bytes():
    """~75% of this generation's VMEM (v7x: 64 MiB, v5e/v6e: 128 MiB)."""
    try:
        cap = pltpu.get_tpu_info().vmem_capacity_bytes
    except Exception:  # pragma: no cover - interpret mode / older runtimes
        cap = 64 * 1024 * 1024
    return int(cap) * 3 // 4


def _footprint_bytes(tm, tn, tk, elt):
    # Double-buffered x1 / w_sum / x2 input tiles + double-buffered f32 output.
    return 2 * (tm * tk + tk * tn + tm * tn) * elt + 2 * tm * tn * 4


# --------------------------------------------------------------------------- #
# Wrappers
# --------------------------------------------------------------------------- #
def bilinear_apply(input1, input2, w_sum, *, tile_override=None):
    """out[b, s] = input2[b, s] * (input1 @ w_sum)[b, s], one Pallas call.

    `w_sum` must be weights.sum(axis=-1), shape (first_dim, second_dim).
    """
    B, F = input1.shape
    B2, S = input2.shape
    assert B == B2, "Input batch sizes must be equal."
    assert w_sum.shape == (F, S), "w_sum shape inconsistent with inputs."

    elt = jnp.dtype(w_sum.dtype).itemsize
    budget = _vmem_budget_bytes()

    if tile_override is not None:
        tm, tn, tk = tile_override
    else:
        tm = _pick_tile(B, _TM_CANDS)
        tn = _pick_tile(S, _TNK_CANDS)
        tk = _pick_tile(F, _TNK_CANDS)
        # Shrink the largest tiles until the double-buffered footprint fits the
        # per-generation VMEM budget (keeps v7x from OOMing at 2048-wide tiles).
        while _footprint_bytes(tm, tn, tk, elt) > budget:
            if tk >= tn and tk > 128:
                new_tk = _next_smaller(F, tk, _TNK_CANDS, 128)
                if new_tk != tk:
                    tk = new_tk
                    continue
            if tn > 128:
                new_tn = _next_smaller(S, tn, _TNK_CANDS, 128)
                if new_tn != tn:
                    tn = new_tn
                    continue
            new_tm = _next_smaller(B, tm, _TM_CANDS, 8)
            if new_tm == tm:
                break  # cannot shrink further; full-dim blocks
            tm = new_tm
        # v7x has two TensorCores that only engage via "parallel" grid axes:
        # guarantee a >= 2-way parallel extent when the shape allows it.
        if (B // tm) * (S // tn) == 1:
            if tn >= 256 and S % (tn // 2) == 0 and (tn // 2) % 128 == 0:
                tn //= 2
            elif tm >= 16 and B % (tm // 2) == 0 and (tm // 2) % 8 == 0:
                tm //= 2

    bt, st, kt = B // tm, S // tn, F // tk

    cost = pl.CostEstimate(
        flops=2 * B * F * S + B * S,
        transcendentals=0,
        bytes_accessed=(
            B * F * jnp.dtype(input1.dtype).itemsize      # x1
            + bt * F * S * elt                             # w_sum re-read per B tile
            + B * S * jnp.dtype(input2.dtype).itemsize     # x2
            + B * S * 4                                    # out (f32)
        ),
    )
    compiler_kwargs = dict(vmem_limit_bytes=budget)

    if kt == 1:
        grid_spec = pltpu.PrefetchScalarGridSpec(
            num_scalar_prefetch=0,
            grid=(bt, st),
            in_specs=[
                pl.BlockSpec((tm, tk), lambda i, j: (i, 0)),  # input1
                pl.BlockSpec((tk, tn), lambda i, j: (0, j)),  # w_sum
                pl.BlockSpec((tm, tn), lambda i, j: (i, j)),  # input2
            ],
            out_specs=pl.BlockSpec((tm, tn), lambda i, j: (i, j)),
        )
        kernel = _bilinear_kernel_single
        semantics = ("parallel", "parallel")
    else:
        grid_spec = pltpu.PrefetchScalarGridSpec(
            num_scalar_prefetch=0,
            grid=(bt, st, kt),
            in_specs=[
                pl.BlockSpec((tm, tk), lambda i, j, k: (i, k)),  # input1
                pl.BlockSpec((tk, tn), lambda i, j, k: (k, j)),  # w_sum (streamed)
                pl.BlockSpec((tm, tn), lambda i, j, k: (i, j)),  # input2
            ],
            out_specs=pl.BlockSpec((tm, tn), lambda i, j, k: (i, j)),
        )
        kernel = _bilinear_kernel_multi
        semantics = ("parallel", "parallel", "arbitrary")

    out = pl.pallas_call(
        kernel,
        out_shape=jax.ShapeDtypeStruct((B, S), jnp.float32),
        grid_spec=grid_spec,
        compiler_params=pltpu.CompilerParams(
            dimension_semantics=semantics, **compiler_kwargs
        ),
        cost_estimate=cost,
    )(input1, w_sum, input2)

    # Mimic .squeeze(1).squeeze(1): only removes a size-1 second_dim.
    if out.shape[1] == 1:
        out = jnp.squeeze(out, axis=1)
    return out


def make_bilinear(weights, *, stream_dtype=jnp.float32):
    """Hoist the O-reduction out of the forward path: compute w_sum once per
    weight update and return a forward(input1, input2) callable.

    `stream_dtype=jnp.bfloat16` halves w_sum HBM bytes (kernel is HBM-bound on
    this stream) at a precision cost vs the float64 PyTorch reference.
    """
    w_sum = jnp.sum(weights.astype(jnp.float32), axis=-1).astype(stream_dtype)

    def forward(input1, input2, *, tile_override=None):
        return bilinear_apply(input1, input2, w_sum, tile_override=tile_override)

    return forward


def bilinear_pallas(input1, input2, weights):
    """One-shot convenience wrapper (recomputes w_sum; prefer make_bilinear)."""
    return make_bilinear(weights)(input1, input2)


def bilinear_reference(input1, input2, weights):
    """Direct translation of the PyTorch broadcast/reduce, for verification."""
    prod = (
        weights[None, :, :, :].astype(jnp.float32)
        * input1[:, :, None, None].astype(jnp.float32)
        * input2[:, None, :, None].astype(jnp.float32)
    )  # (B, F, S, O)
    out = prod.sum(axis=1).sum(axis=2)  # (B, S)
    if out.shape[1] == 1:
        out = jnp.squeeze(out, axis=1)
    return out


if __name__ == "__main__":
    key = jax.random.PRNGKey(0)
    k1, k2, k3, k4, k5, k6 = jax.random.split(key, 6)

    # --- Test 1: toy shapes matching the module's usage (single-K fast path,
    #             grid (1, 1), no accumulator plumbing).
    B, F, S, O = 8, 32, 16, 8
    x1 = jax.random.normal(k1, (B, F), dtype=jnp.float32)
    x2 = jax.random.normal(k2, (B, S), dtype=jnp.float32)
    w = jax.random.normal(k3, (F, S, O), dtype=jnp.float32)

    fwd = make_bilinear(w)  # w_sum computed once, reused across calls
    out = fwd(x1, x2)
    jax.block_until_ready(out)
    ref = bilinear_reference(x1, x2, w)
    assert out.shape == ref.shape, (out.shape, ref.shape)
    assert jnp.allclose(out, ref, atol=1e-2, rtol=1e-2), "mismatch (toy shapes)"

    # --- Test 2: small shapes with a forced tile override so the multi-K
    #             accumulate-into-output path (grid = (1, 1, 2)) runs cheaply.
    B2, F2, S2, O2 = 8, 256, 128, 4
    x1b = jax.random.normal(k4, (B2, F2), dtype=jnp.float32)
    x2b = jax.random.normal(k5, (B2, S2), dtype=jnp.float32)
    wb = jax.random.normal(k6, (F2, S2, O2), dtype=jnp.float32)

    fwd_b = make_bilinear(wb)
    outb = fwd_b(x1b, x2b, tile_override=(8, 128, 128))
    jax.block_until_ready(outb)
    refb = bilinear_reference(x1b, x2b, wb)
    assert outb.shape == refb.shape, (outb.shape, refb.shape)
    assert jnp.allclose(outb, refb, atol=1e-1, rtol=1e-2), "mismatch (multi-K)"

    print("KERNEL_OK")
</pallas_src>

<mosaic_0001>
module attributes {stable_mosaic.version = 11 : i64} {
  func.func @_bilinear_kernel_single(%arg0: i32, %arg1: i32, %arg2: memref<8x32xf32, #tpu.memory_space<vmem>>, %arg3: memref<32x16xf32, #tpu.memory_space<vmem>>, %arg4: memref<8x16xf32, #tpu.memory_space<vmem>>, %arg5: memref<8x16xf32, #tpu.memory_space<vmem>>) attributes {dimension_semantics = [#tpu.dimension_semantics<parallel>, #tpu.dimension_semantics<parallel>], iteration_bounds = array<i64: 1, 1>, scalar_prefetch = 0 : i64, scratch_operands = 0 : i64, tpu.core_type = #tpu.core_type<tc>, window_params = [{transform_indices = @transform_0, window_bounds = array<i64: 8, 32>}, {transform_indices = @transform_1, window_bounds = array<i64: 32, 16>}, {transform_indices = @transform_2, window_bounds = array<i64: 8, 16>}, {transform_indices = @transform_3, window_bounds = array<i64: 8, 16>}]} {
    %c0 = arith.constant 0 : index
    %c0_0 = arith.constant 0 : index
    %0 = vector.load %arg2[%c0, %c0_0] : memref<8x32xf32, #tpu.memory_space<vmem>>, vector<8x32xf32>
    %c0_1 = arith.constant 0 : index
    %c0_2 = arith.constant 0 : index
    %1 = vector.load %arg3[%c0_1, %c0_2] : memref<32x16xf32, #tpu.memory_space<vmem>>, vector<32x16xf32>
    %cst = arith.constant dense<0.000000e+00> : vector<8x16xf32>
    %2 = tpu.matmul %0, %1, %cst {dimension_numbers = #tpu.dot_dimension_numbers<[1], [0], [0], [1], [0, 0, 1, 1], [], []>} : vector<8x32xf32>, vector<32x16xf32>, vector<8x16xf32> -> vector<8x16xf32>
    %c0_3 = arith.constant 0 : index
    %c0_4 = arith.constant 0 : index
    %3 = vector.load %arg4[%c0_3, %c0_4] : memref<8x16xf32, #tpu.memory_space<vmem>>, vector<8x16xf32>
    %4 = arith.mulf %2, %3 : vector<8x16xf32>
    %c0_5 = arith.constant 0 : index
    %c0_6 = arith.constant 0 : index
    %5 = vector.load %arg5[%c0_5, %c0_6] : memref<8x16xf32, #tpu.memory_space<vmem>>, vector<8x16xf32>
    tpu.vector_store %arg5[%c0_5, %c0_6], %4 {strides = array<i32>} : memref<8x16xf32, #tpu.memory_space<vmem>>, vector<8x16xf32>,
    return
  }
  func.func @transform_0(%arg0: i32, %arg1: i32) -> (i32, i32) {
    %c0_i32 = arith.constant 0 : i32
    %c0_i32_0 = arith.constant 0 : i32
    return %arg0, %c0_i32 : i32, i32
  }
  func.func @transform_1(%arg0: i32, %arg1: i32) -> (i32, i32) {
    %c0_i32 = arith.constant 0 : i32
    %c0_i32_0 = arith.constant 0 : i32
    return %c0_i32, %arg1 : i32, i32
  }
  func.func @transform_2(%arg0: i32, %arg1: i32) -> (i32, i32) {
    %c0_i32 = arith.constant 0 : i32
    return %arg0, %arg1 : i32, i32
  }
  func.func @transform_3(%arg0: i32, %arg1: i32) -> (i32, i32) {
    %c0_i32 = arith.constant 0 : i32
    return %arg0, %arg1 : i32, i32
  }
}

</mosaic_0001>

<bundles_post_ra>
// kernel: tpu_custom_call.1
= control target key start
LH: loop header
LB: loop body
LE: loop exit
PB: predicated region body
PF: predicated region fallthrough
CT: control target
= control target key end

     0   :  { %v154_v1 = vmov 0.0   ;;  %vm155_vm0 = vmmov 0   ;;  %s198_s0 = inlined_call_operand.vmem [shape: f32[8,32], index: 0, kind: input, shape index: {}]   ;;  %s199_s1 = inlined_call_operand.vmem [shape: f32[32,16], index: 1, kind: input, shape index: {}]   ;;  %s200_s2 = inlined_call_operand.vmem [shape: f32[8,16], index: 2, kind: input, shape index: {}]   ;;  %s201_s3 = inlined_call_operand.hbm [shape: f32[8,16], index: 3, kind: output, shape index: {}]  }
   0x1   :  { %v19_v0 = vld [vmem:[%s199_s1 + $0x18] sm:$0xff]  ;;  %118 = vmatprep.subr.mxu0 %v154_v1  ;;  %v18_v2 = vld [vmem:[%s199_s1 + $0x10] sm:$0xff]  ;;  %126 = vmatprep.mubr.msk.f32.mxu0 %vm155_vm0, %v154_v1 }
   0x2   :  { %8 = vsyncpa [#allocation3], 0  ;;  %119 = vmatpush3.msra.mxu0 %v19_v0  ;;  %v17_v3 = vld [vmem:[%s199_s1 + $0x8] sm:$0xff]  ;;  %v16_v4 = vld [vmem:[%s199_s1] sm:$0xff]  ;;  %vm20_vm1 = vcmask 261120   ;;  %s156_s24 = smov [#allocation2]  }
   0x3   :  { %120 = vmatprep.subr.mxu0 %v154_v1  ;;  %v15_v5 = vld [vmem:[%s198_s0] sm:$0xff]  ;;  %s104_s25 = sshll.u32 %s156_s24, 4  ;;  %vm96_vm2 = vcmask 130048   ;;  %s105_s25 = int_to_ptr.vmem [resolvable:$true] %s104_s25 }
   0x4   :  { %121 = vmatpush3.msra.mxu0 %v18_v2  ;;  %v94_v6 = vld [vmem:[%s200_s2] sm:$0xff]  ;;  %s132_s1 = scalar_lea.vmem %s105_s25, 128  ;;  %p137_p1 = scmp.lt.s32.totalorder %s105_s25, %s105_s25 }
   0x5   :  { %122 = vmatprep.subr.mxu0 %v154_v1  ;;  %p133_p0 = scmp.ne.s32.totalorder %s105_s25, %s132_s1  ;;  %p138_p2 = scmp.lt.s32.totalorder %s132_s1, %s132_s1 }
   0x6   :  { %123 = vmatpush3.msra.mxu0 %v17_v3 }
   0x7   :  { %124 = vmatprep.subr.mxu0 %v154_v1  ;;  %p139_p3 = por %p138_p2, %p137_p1 }
   0x8   :  { %125 = vmatpush3.msra.mxu0 %v16_v4 }
   0x9   :  { %127 = vmatmul.mubr.msk.f32.vlgmr.msra.gmra.mxu0 %vm20_vm1, %v15_v5  ;;  %p140_p4 = pnand %p139_p3, %p133_p0 }
  0xc9   :  { %v90_v7 = vpop.f32.mrf.mxu0 }
  0xca   :  { %v95_v8 = vmul.f32 %v94_v6, %v90_v7 }
  0xcb   :  { %v128_v9 = vpop.f32.mrf.mxu0 }
  0xcc   :  { %97 = vst.msk [vmem:[#allocation2] sm:$0xff] %vm96_vm2, %v95_v8 }
  0xcd   :  { %143 = shalt.err (!%p140_p4)
}
  0xce   :  { %107 = dma.vmem_to_hbm [thread:$0]  %s105_s25, 128, %s201_s3, [#allocation3]  }
  0xcf   :  { %152 = dma.done.wait [#allocation3], 128  }
  0xd0   :  { %153 = vsyncadd [#allocation3], 4294967168 }
  0xd1   :  { %111 = vsyncpa [#allocation3], 1 }

</bundles_post_ra>
